<compile_context>
chip_gen: v5e
topology: v5e:2x2
jax: 0.10.0
libtpu: 0.0.40
codegen_flags: <defaults>
</compile_context>

<pallas_src>
import functools
import itertools

import numpy as np
import jax
import jax.numpy as jnp
from jax.experimental import pallas as pl
from jax.experimental.pallas import tpu as pltpu


_EPS_COST = 1e-7    # clamp for approx-reciprocal denominators (matching cost: ordering only)
_EPS_LOSS = 1e-12   # clamp so degenerate / masked-out padded pairs can never produce NaN


def _round_up(x, m):
    return ((x + m - 1) // m) * m


# ----------------------------------------------------------------------------------
# Kernel A: batched DETR matching cost matrix + log-probs.
# Block refs: logits (Bb,Q,C1), boxes (Bb,Q,4), labels (Bb,1,Gp), gt_t (Bb,4,Gp)
#            -> cost (Bb,Q,Gp), log_probs (Bb,Q,C1)
# ----------------------------------------------------------------------------------
def _cost_matrix_kernel(logits_ref, boxes_ref, labels_ref, gt_t_ref,
                        cost_ref, logp_ref, *, w_class, w_bbox, w_giou):
    logits = logits_ref[...].astype(jnp.float32)              # (Bb, Q, C1)
    Bb, Q, C1 = logits.shape
    m = jnp.max(logits, axis=-1, keepdims=True)
    lse = m + jnp.log(jnp.sum(jnp.exp(logits - m), axis=-1, keepdims=True))
    log_probs = logits - lse                                  # (Bb, Q, C1)
    logp_ref[...] = log_probs.astype(logp_ref.dtype)

    labels = labels_ref[...]                                  # (Bb, 1, Gp) int32
    Gp = labels.shape[-1]
    cls_iota = jax.lax.broadcasted_iota(jnp.int32, (Bb, C1, Gp), 1)
    onehot = (labels == cls_iota).astype(jnp.float32)         # (Bb, C1, Gp)

    # Class gather as one MXU batched matmul: cost_class[b,q,g] = -log_probs[b,q,labels[b,g]]
    cost_class = -jnp.einsum('bqc,bcg->bqg', log_probs, onehot,
                             preferred_element_type=jnp.float32)   # (Bb, Q, Gp)

    pb = boxes_ref[...].astype(jnp.float32)                   # (Bb, Q, 4)  cxcywh
    gbt = gt_t_ref[...].astype(jnp.float32)                   # (Bb, 4, Gp) cxcywh (transposed)
    p_cx, p_cy = pb[:, :, 0:1], pb[:, :, 1:2]
    p_w, p_h = pb[:, :, 2:3], pb[:, :, 3:4]                   # (Bb, Q, 1)
    g_cx, g_cy = gbt[:, 0:1, :], gbt[:, 1:2, :]
    g_w, g_h = gbt[:, 2:3, :], gbt[:, 3:4, :]                 # (Bb, 1, Gp)

    # pairwise L1 (torch.cdist p=1) in cxcywh space
    cost_bbox = (jnp.abs(p_cx - g_cx) + jnp.abs(p_cy - g_cy)
                 + jnp.abs(p_w - g_w) + jnp.abs(p_h - g_h))   # (Bb, Q, Gp)

    # pairwise generalized IoU in xyxy space
    p_x1, p_y1 = p_cx - 0.5 * p_w, p_cy - 0.5 * p_h
    p_x2, p_y2 = p_cx + 0.5 * p_w, p_cy + 0.5 * p_h
    g_x1, g_y1 = g_cx - 0.5 * g_w, g_cy - 0.5 * g_h
    g_x2, g_y2 = g_cx + 0.5 * g_w, g_cy + 0.5 * g_h
    area_p = (p_x2 - p_x1) * (p_y2 - p_y1)
    area_g = (g_x2 - g_x1) * (g_y2 - g_y1)
    iw = jnp.maximum(jnp.minimum(p_x2, g_x2) - jnp.maximum(p_x1, g_x1), 0.0)
    ih = jnp.maximum(jnp.minimum(p_y2, g_y2) - jnp.maximum(p_y1, g_y1), 0.0)
    inter = iw * ih
    union = area_p + area_g - inter
    inv_union = pl.reciprocal(jnp.maximum(union, _EPS_COST), approx=True)   # EUP, cost only
    iou = inter * inv_union
    cw = jnp.maximum(jnp.maximum(p_x2, g_x2) - jnp.minimum(p_x1, g_x1), 0.0)
    ch = jnp.maximum(jnp.maximum(p_y2, g_y2) - jnp.minimum(p_y1, g_y1), 0.0)
    area_c = cw * ch
    inv_area_c = pl.reciprocal(jnp.maximum(area_c, _EPS_COST), approx=True)
    giou = iou - (area_c - union) * inv_area_c                # (Bb, Q, Gp)

    cost = w_bbox * cost_bbox + w_class * cost_class + w_giou * (-giou)
    cost_ref[...] = cost.astype(cost_ref.dtype)


def compute_cost_and_logprobs(pred_logits, pred_boxes, gt_labels, gt_boxes,
                              num_classes, w_class, w_bbox, w_giou):
    B, Q, C1 = pred_logits.shape
    G = gt_labels.shape[1]
    Gp = max(128, _round_up(G, 128))          # lane-dense cost columns / output store

    labels_p = jnp.full((B, 1, Gp), num_classes, dtype=jnp.int32)
    labels_p = labels_p.at[:, 0, :G].set(gt_labels.astype(jnp.int32))
    gt_boxes_p = jnp.zeros((B, Gp, 4), jnp.float32)
    gt_boxes_p = gt_boxes_p.at[:, :G, :].set(gt_boxes.astype(jnp.float32))
    gt_boxes_t = jnp.transpose(gt_boxes_p, (0, 2, 1))         # (B, 4, Gp)

    # Batches per grid step: amortize the ~600-cycle step overhead, but keep grid >= 2 so both
    # v7x TensorCores get work, and keep blocks well inside (v7x) VMEM.
    per_batch_bytes = 4 * (2 * Q * C1 + Q * 4 + 5 * Gp + Q * Gp)
    if B <= 1:
        Bb = 1
    else:
        Bb = max(1, min(B // 2, (8 << 20) // max(per_batch_bytes, 1)))
        while B % Bb != 0:
            Bb -= 1
    grid = (B // Bb,)
    block_bytes = Bb * per_batch_bytes
    vmem_limit = int(min(max(4 * block_bytes + (1 << 20), 16 << 20), 48 << 20))

    kernel = functools.partial(_cost_matrix_kernel, w_class=float(w_class),
                               w_bbox=float(w_bbox), w_giou=float(w_giou))
    cost, log_probs = pl.pallas_call(
        kernel,
        out_shape=(jax.ShapeDtypeStruct((B, Q, Gp), jnp.float32),
                   jax.ShapeDtypeStruct((B, Q, C1), jnp.float32)),
        grid=grid,
        in_specs=[
            pl.BlockSpec((Bb, Q, C1), lambda b: (b, 0, 0)),
            pl.BlockSpec((Bb, Q, 4), lambda b: (b, 0, 0)),
            pl.BlockSpec((Bb, 1, Gp), lambda b: (b, 0, 0)),
            pl.BlockSpec((Bb, 4, Gp), lambda b: (b, 0, 0)),
        ],
        out_specs=(
            pl.BlockSpec((Bb, Q, Gp), lambda b: (b, 0, 0)),
            pl.BlockSpec((Bb, Q, C1), lambda b: (b, 0, 0)),
        ),
        compiler_params=pltpu.CompilerParams(
            dimension_semantics=("parallel",),
            vmem_limit_bytes=vmem_limit),
    )(pred_logits.astype(jnp.float32),
      pred_boxes[..., :4].astype(jnp.float32),
      labels_p, gt_boxes_t)
    return cost, log_probs


# ----------------------------------------------------------------------------------
# Kernel B+C (fused): class-weighted cross entropy + matched-pair L1 / GIoU losses.
# logp_t (C1, Np) with Np = padded B*Q on the lane axis; matched boxes as (4, Mp) with a
# (1, Mp) validity mask (static Mp -> compile-once).  Output: SMEM f32[3] = [ce, l1, giou].
# ----------------------------------------------------------------------------------
def _ce_and_box_loss_kernel(logp_ref, tgt_ref, w_ref, p_ref, g_ref, mask_ref, out_ref):
    # ---- class-weighted cross entropy (F.cross_entropy with a weight vector) ----
    logp = logp_ref[...]                                      # (C1, Np)
    C1, Np = logp.shape
    tgt = tgt_ref[...]                                        # (1, Np) int32 (pad sentinel = C1)
    iota_c = jax.lax.broadcasted_iota(jnp.int32, (C1, Np), 0)
    onehot = (tgt == iota_c).astype(jnp.float32)              # (C1, Np)
    nll = -jnp.sum(logp * onehot, axis=0, keepdims=True)      # (1, Np)
    w = jnp.sum(onehot * w_ref[...], axis=0, keepdims=True)   # (1, Np)
    out_ref[0] = jnp.sum(nll * w) / jnp.sum(w)

    # ---- matched-pair box losses: coords on sublanes, pairs lane-dense ----
    p = p_ref[...].astype(jnp.float32)                        # (4, Mp) cxcywh
    g = g_ref[...].astype(jnp.float32)                        # (4, Mp) cxcywh
    msk = mask_ref[...]                                       # (1, Mp)
    nvalid = jnp.maximum(jnp.sum(msk), 1.0)

    # F.l1_loss (mean over matched * 4 elements)
    out_ref[1] = jnp.sum(jnp.abs(p - g) * msk) / (4.0 * nvalid)

    p_cx, p_cy, p_w, p_h = p[0:1, :], p[1:2, :], p[2:3, :], p[3:4, :]
    g_cx, g_cy, g_w, g_h = g[0:1, :], g[1:2, :], g[2:3, :], g[3:4, :]
    p_x1, p_y1 = p_cx - 0.5 * p_w, p_cy - 0.5 * p_h
    p_x2, p_y2 = p_cx + 0.5 * p_w, p_cy + 0.5 * p_h
    g_x1, g_y1 = g_cx - 0.5 * g_w, g_cy - 0.5 * g_h
    g_x2, g_y2 = g_cx + 0.5 * g_w, g_cy + 0.5 * g_h
    area_p = (p_x2 - p_x1) * (p_y2 - p_y1)
    area_g = (g_x2 - g_x1) * (g_y2 - g_y1)
    iw = jnp.maximum(jnp.minimum(p_x2, g_x2) - jnp.maximum(p_x1, g_x1), 0.0)
    ih = jnp.maximum(jnp.minimum(p_y2, g_y2) - jnp.maximum(p_y1, g_y1), 0.0)
    inter = iw * ih
    union = area_p + area_g - inter
    iou = inter / jnp.maximum(union, _EPS_LOSS)               # exact division: feeds the loss
    cw = jnp.maximum(jnp.maximum(p_x2, g_x2) - jnp.minimum(p_x1, g_x1), 0.0)
    ch = jnp.maximum(jnp.maximum(p_y2, g_y2) - jnp.minimum(p_y1, g_y1), 0.0)
    area_c = cw * ch
    giou = iou - (area_c - union) / jnp.maximum(area_c, _EPS_LOSS)   # (1, Mp) diag GIoU
    out_ref[2] = jnp.sum((1.0 - giou) * msk) / nvalid


def ce_and_box_losses(log_probs, target_classes, empty_weight,
                      matched_pred_t, matched_gt_t, match_mask):
    B, Q, C1 = log_probs.shape
    N = B * Q
    Np = max(128, _round_up(N, 128))
    # lane-dense CE: (C1, N) with N on lanes (tiny XLA transpose; avoids a 2nd log-softmax)
    logp_t = jnp.transpose(log_probs, (2, 0, 1)).reshape(C1, N)
    logp_t = jnp.pad(logp_t, ((0, 0), (0, Np - N)))
    tgt = jnp.full((1, Np), C1, jnp.int32)                    # sentinel -> zero weight/NLL
    tgt = tgt.at[0, :N].set(target_classes.reshape(N).astype(jnp.int32))
    w_col = empty_weight.reshape(C1, 1).astype(jnp.float32)

    out = pl.pallas_call(
        _ce_and_box_loss_kernel,
        out_shape=jax.ShapeDtypeStruct((3,), jnp.float32),
        in_specs=[pl.BlockSpec(memory_space=pltpu.MemorySpace.VMEM)] * 6,
        out_specs=pl.BlockSpec(memory_space=pltpu.MemorySpace.SMEM),
    )(logp_t, tgt, w_col,
      matched_pred_t.astype(jnp.float32), matched_gt_t.astype(jnp.float32),
      match_mask.astype(jnp.float32))
    return out[0], out[1], out[2]


# ----------------------------------------------------------------------------------
# Host-side Hungarian matching (mirrors .cpu().numpy() + scipy in the reference).
# TODO(synk): linear_sum_assignment has no Pallas equivalent; it stays on host as in the spec.
# ----------------------------------------------------------------------------------
def _linear_sum_assignment(cost):
    try:
        from scipy.optimize import linear_sum_assignment
        return linear_sum_assignment(cost)
    except Exception:
        R, C = cost.shape
        if R >= C:
            best = None
            for perm in itertools.permutations(range(R), C):
                s = float(sum(cost[perm[c], c] for c in range(C)))
                if best is None or s < best[0]:
                    best = (s, perm)
            rows = np.asarray(best[1], np.int64)
            cols = np.arange(C, dtype=np.int64)
        else:
            best = None
            for perm in itertools.permutations(range(C), R):
                s = float(sum(cost[r, perm[r]] for r in range(R)))
                if best is None or s < best[0]:
                    best = (s, perm)
            rows = np.arange(R, dtype=np.int64)
            cols = np.asarray(best[1], np.int64)
        order = np.argsort(rows)
        return rows[order], cols[order]


class AgentDetectionLoss:
    def __init__(self, num_classes=3, cost_class=2.0, cost_bbox=5.0, cost_giou=2.0):
        self.num_classes = num_classes
        self.cost_weights = {'class': cost_class, 'bbox': cost_bbox, 'giou': cost_giou}
        ew = np.ones(num_classes + 1, dtype=np.float32)
        ew[-1] = 0.1
        self.empty_weight = jnp.asarray(ew)

    def __call__(self, pred_outputs, gt_targets):
        pred_logits = pred_outputs['pred_logits']     # (B, Q, C+1)
        pred_boxes = pred_outputs['pred_boxes']       # (B, Q, 4) cxcywh
        gt_labels = gt_targets['labels']              # (B, G) int32 (== num_classes: padded)
        gt_boxes = gt_targets['boxes']                # (B, G, 4) cxcywh
        B, Q, C1 = pred_logits.shape
        G = gt_labels.shape[1]

        # --- Hot path 1: matching cost matrices + log-probs (Pallas kernel A) ---
        cost_all, log_probs = compute_cost_and_logprobs(
            pred_logits, pred_boxes, gt_labels, gt_boxes, self.num_classes,
            self.cost_weights['class'], self.cost_weights['bbox'], self.cost_weights['giou'])
        cost_np = np.asarray(jax.device_get(cost_all))
        labels_np = np.asarray(jax.device_get(gt_labels))

        indices = []
        for i in range(B):
            valid = np.nonzero(labels_np[i] < self.num_classes)[0]
            if valid.size == 0:
                indices.append((np.zeros((0,), np.int64), np.zeros((0,), np.int64)))
                continue
            cm = cost_np[i][:, valid]
            r, c = _linear_sum_assignment(cm)
            # NOTE: as in the reference, column indices refer to the *filtered* GT set.
            indices.append((np.asarray(r, np.int64), np.asarray(c, np.int64)))

        # --- static-shape matched-pair arrays (compile-once, padded + masked) ---
        Mmax = B * min(Q, G)
        Mp = max(128, _round_up(Mmax, 128))
        src_b = np.zeros(Mp, np.int32); src_q = np.zeros(Mp, np.int32)
        tgt_b = np.zeros(Mp, np.int32); tgt_t = np.zeros(Mp, np.int32)
        mask = np.zeros((1, Mp), np.float32)
        target_classes = np.full((B, Q), self.num_classes, dtype=np.int32)
        k = 0
        for i, (r, c) in enumerate(indices):
            for rr, cc in zip(r, c):
                rr, cc = int(rr), int(cc)
                src_b[k] = i; src_q[k] = rr; tgt_b[k] = i; tgt_t[k] = cc
                mask[0, k] = 1.0
                # As in the reference: index the unfiltered GT labels with the matched col idx.
                target_classes[i, rr] = labels_np[i, cc]
                k += 1

        matched_pred_t = jnp.transpose(
            pred_boxes[jnp.asarray(src_b), jnp.asarray(src_q), :4].astype(jnp.float32))  # (4, Mp)
        matched_gt_t = jnp.transpose(
            gt_boxes[jnp.asarray(tgt_b), jnp.asarray(tgt_t), :].astype(jnp.float32))     # (4, Mp)

        # --- Hot path 2: fused weighted CE + matched-box losses (Pallas kernel B+C) ---
        loss_ce, loss_bbox, loss_giou = ce_and_box_losses(
            log_probs, jnp.asarray(target_classes), self.empty_weight,
            matched_pred_t, matched_gt_t, jnp.asarray(mask))

        return ({'loss_ce': loss_ce, 'loss_bbox': loss_bbox, 'loss_giou': loss_giou},
                indices)


if __name__ == "__main__":
    B, Q, G, NC = 2, 8, 4, 3
    C1 = NC + 1
    key = jax.random.PRNGKey(0)
    k1, k2, k3 = jax.random.split(key, 3)
    pred_logits = jax.random.normal(k1, (B, Q, C1), dtype=jnp.float32)
    pred_boxes = jax.nn.sigmoid(jax.random.normal(k2, (B, Q, 4), dtype=jnp.float32))
    gt_boxes = jax.random.uniform(k3, (B, G, 4), dtype=jnp.float32, minval=0.1, maxval=0.5)
    # label == NC marks padded / invalid GT slots (filtered out before matching)
    gt_labels = jnp.array([[0, 2, 1, NC], [1, 0, NC, NC]], dtype=jnp.int32)

    criterion = AgentDetectionLoss(num_classes=NC)
    losses, indices = criterion({'pred_logits': pred_logits, 'pred_boxes': pred_boxes},
                                {'labels': gt_labels, 'boxes': gt_boxes})
    vals = [jax.block_until_ready(v) for v in losses.values()]
    assert all(np.isfinite(float(np.asarray(v))) for v in vals)
    print("KERNEL_OK")
</pallas_src>

<mosaic_0001>
module attributes {stable_mosaic.version = 11 : i64} {
  func.func @_cost_matrix_kernel(%arg0: i32, %arg1: memref<1x8x4xf32, #tpu.memory_space<vmem>>, %arg2: memref<1x8x4xf32, #tpu.memory_space<vmem>>, %arg3: memref<1x1x128xi32, #tpu.memory_space<vmem>>, %arg4: memref<1x4x128xf32, #tpu.memory_space<vmem>>, %arg5: memref<1x8x128xf32, #tpu.memory_space<vmem>>, %arg6: memref<1x8x4xf32, #tpu.memory_space<vmem>>) attributes {dimension_semantics = [#tpu.dimension_semantics<parallel>], iteration_bounds = array<i64: 2>, scalar_prefetch = 0 : i64, scratch_operands = 0 : i64, tpu.core_type = #tpu.core_type<tc>, window_params = [{transform_indices = @transform_0, window_bounds = array<i64: 1, 8, 4>}, {transform_indices = @transform_1, window_bounds = array<i64: 1, 8, 4>}, {transform_indices = @transform_2, window_bounds = array<i64: 1, 1, 128>}, {transform_indices = @transform_3, window_bounds = array<i64: 1, 4, 128>}, {transform_indices = @transform_4, window_bounds = array<i64: 1, 8, 128>}, {transform_indices = @transform_5, window_bounds = array<i64: 1, 8, 4>}]} {
    %c0 = arith.constant 0 : index
    %c0_0 = arith.constant 0 : index
    %c0_1 = arith.constant 0 : index
    %0 = vector.load %arg1[%c0, %c0_0, %c0_1] : memref<1x8x4xf32, #tpu.memory_space<vmem>>, vector<1x8x4xf32>
    %cst = arith.constant dense<0xFF800000> : vector<1x8xf32>
    %1 = vector.multi_reduction <maximumf>, %0, %cst [2] : vector<1x8x4xf32> to vector<1x8xf32>
    %2 = vector.shape_cast %1 : vector<1x8xf32> to vector<1x8x1xf32>
    %3 = vector.broadcast %2 : vector<1x8x1xf32> to vector<1x8x4xf32>
    %4 = arith.subf %0, %3 : vector<1x8x4xf32>
    %5 = math.exp %4 : vector<1x8x4xf32>
    %cst_2 = arith.constant dense<0.000000e+00> : vector<1x8xf32>
    %6 = vector.multi_reduction <add>, %5, %cst_2 [2] : vector<1x8x4xf32> to vector<1x8xf32>
    %7 = vector.shape_cast %6 : vector<1x8xf32> to vector<1x8x1xf32>
    %8 = math.log %7 : vector<1x8x1xf32>
    %9 = arith.addf %2, %8 : vector<1x8x1xf32>
    %10 = vector.broadcast %9 : vector<1x8x1xf32> to vector<1x8x4xf32>
    %11 = arith.subf %0, %10 : vector<1x8x4xf32>
    %c0_3 = arith.constant 0 : index
    %c0_4 = arith.constant 0 : index
    %c0_5 = arith.constant 0 : index
    %12 = vector.load %arg6[%c0_3, %c0_4, %c0_5] : memref<1x8x4xf32, #tpu.memory_space<vmem>>, vector<1x8x4xf32>
    tpu.vector_store %arg6[%c0_3, %c0_4, %c0_5], %11 {strides = array<i32>} : memref<1x8x4xf32, #tpu.memory_space<vmem>>, vector<1x8x4xf32>,
    %c0_6 = arith.constant 0 : index
    %c0_7 = arith.constant 0 : index
    %c0_8 = arith.constant 0 : index
    %13 = vector.load %arg3[%c0_6, %c0_7, %c0_8] : memref<1x1x128xi32, #tpu.memory_space<vmem>>, vector<1x1x128xi32>
    %14 = tpu.iota {dimensions = array<i32: 1>} : vector<1x4x128xi32>
    %15 = vector.broadcast %13 : vector<1x1x128xi32> to vector<1x4x128xi32>
    %16 = arith.cmpi eq, %15, %14 : vector<1x4x128xi32>
    %17 = arith.extui %16 : vector<1x4x128xi1> to vector<1x4x128xi32>
    %18 = arith.sitofp %17 : vector<1x4x128xi32> to vector<1x4x128xf32>
    "tpu.trace_start"() <{level = 10 : i32, message = "bqc,bcg->bqg"}> : () -> ()
    %cst_9 = arith.constant dense<0.000000e+00> : vector<1x8x128xf32>
    %19 = tpu.matmul %11, %18, %cst_9 {dimension_numbers = #tpu.dot_dimension_numbers<[2], [1], [1], [2], [0, 0, 0, 1, 1, 2], [0], [0]>} : vector<1x8x4xf32>, vector<1x4x128xf32>, vector<1x8x128xf32> -> vector<1x8x128xf32>
    "tpu.trace_stop"() : () -> ()
    %cst_10 = arith.constant 0.000000e+00 : f32
    %20 = vector.broadcast %cst_10 : f32 to vector<1x8x128xf32>
    %21 = arith.subf %20, %19 : vector<1x8x128xf32>
    %c0_11 = arith.constant 0 : index
    %c0_12 = arith.constant 0 : index
    %c0_13 = arith.constant 0 : index
    %22 = vector.load %arg2[%c0_11, %c0_12, %c0_13] : memref<1x8x4xf32, #tpu.memory_space<vmem>>, vector<1x8x4xf32>
    %c0_14 = arith.constant 0 : index
    %c0_15 = arith.constant 0 : index
    %c0_16 = arith.constant 0 : index
    %23 = vector.load %arg4[%c0_14, %c0_15, %c0_16] : memref<1x4x128xf32, #tpu.memory_space<vmem>>, vector<1x4x128xf32>
    %24 = vector.extract_strided_slice %22 {offsets = [0, 0, 0], sizes = [1, 8, 1], strides = [1, 1, 1]} : vector<1x8x4xf32> to vector<1x8x1xf32>
    %25 = vector.extract_strided_slice %22 {offsets = [0, 0, 1], sizes = [1, 8, 1], strides = [1, 1, 1]} : vector<1x8x4xf32> to vector<1x8x1xf32>
    %26 = vector.extract_strided_slice %22 {offsets = [0, 0, 2], sizes = [1, 8, 1], strides = [1, 1, 1]} : vector<1x8x4xf32> to vector<1x8x1xf32>
    %27 = vector.extract_strided_slice %22 {offsets = [0, 0, 3], sizes = [1, 8, 1], strides = [1, 1, 1]} : vector<1x8x4xf32> to vector<1x8x1xf32>
    %28 = vector.extract_strided_slice %23 {offsets = [0, 0, 0], sizes = [1, 1, 128], strides = [1, 1, 1]} : vector<1x4x128xf32> to vector<1x1x128xf32>
    %29 = vector.extract_strided_slice %23 {offsets = [0, 1, 0], sizes = [1, 1, 128], strides = [1, 1, 1]} : vector<1x4x128xf32> to vector<1x1x128xf32>
    %30 = vector.extract_strided_slice %23 {offsets = [0, 2, 0], sizes = [1, 1, 128], strides = [1, 1, 1]} : vector<1x4x128xf32> to vector<1x1x128xf32>
    %31 = vector.extract_strided_slice %23 {offsets = [0, 3, 0], sizes = [1, 1, 128], strides = [1, 1, 1]} : vector<1x4x128xf32> to vector<1x1x128xf32>
    %32 = vector.broadcast %24 : vector<1x8x1xf32> to vector<1x8x128xf32>
    %33 = vector.broadcast %28 : vector<1x1x128xf32> to vector<1x8x128xf32>
    %34 = arith.subf %32, %33 : vector<1x8x128xf32>
    %35 = math.absf %34 : vector<1x8x128xf32>
    %36 = vector.broadcast %25 : vector<1x8x1xf32> to vector<1x8x128xf32>
    %37 = vector.broadcast %29 : vector<1x1x128xf32> to vector<1x8x128xf32>
    %38 = arith.subf %36, %37 : vector<1x8x128xf32>
    %39 = math.absf %38 : vector<1x8x128xf32>
    %40 = arith.addf %35, %39 : vector<1x8x128xf32>
    %41 = vector.broadcast %26 : vector<1x8x1xf32> to vector<1x8x128xf32>
    %42 = vector.broadcast %30 : vector<1x1x128xf32> to vector<1x8x128xf32>
    %43 = arith.subf %41, %42 : vector<1x8x128xf32>
    %44 = math.absf %43 : vector<1x8x128xf32>
    %45 = arith.addf %40, %44 : vector<1x8x128xf32>
    %46 = vector.broadcast %27 : vector<1x8x1xf32> to vector<1x8x128xf32>
    %47 = vector.broadcast %31 : vector<1x1x128xf32> to vector<1x8x128xf32>
    %48 = arith.subf %46, %47 : vector<1x8x128xf32>
    %49 = math.absf %48 : vector<1x8x128xf32>
    %50 = arith.addf %45, %49 : vector<1x8x128xf32>
    %cst_17 = arith.constant 5.000000e-01 : f32
    %51 = vector.broadcast %cst_17 : f32 to vector<1x8x1xf32>
    %52 = arith.mulf %51, %26 : vector<1x8x1xf32>
    %53 = arith.subf %24, %52 : vector<1x8x1xf32>
    %cst_18 = arith.constant 5.000000e-01 : f32
    %54 = vector.broadcast %cst_18 : f32 to vector<1x8x1xf32>
    %55 = arith.mulf %54, %27 : vector<1x8x1xf32>
    %56 = arith.subf %25, %55 : vector<1x8x1xf32>
    %cst_19 = arith.constant 5.000000e-01 : f32
    %57 = vector.broadcast %cst_19 : f32 to vector<1x8x1xf32>
    %58 = arith.mulf %57, %26 : vector<1x8x1xf32>
    %59 = arith.addf %24, %58 : vector<1x8x1xf32>
    %cst_20 = arith.constant 5.000000e-01 : f32
    %60 = vector.broadcast %cst_20 : f32 to vector<1x8x1xf32>
    %61 = arith.mulf %60, %27 : vector<1x8x1xf32>
    %62 = arith.addf %25, %61 : vector<1x8x1xf32>
    %cst_21 = arith.constant 5.000000e-01 : f32
    %63 = vector.broadcast %cst_21 : f32 to vector<1x1x128xf32>
    %64 = arith.mulf %63, %30 : vector<1x1x128xf32>
    %65 = arith.subf %28, %64 : vector<1x1x128xf32>
    %cst_22 = arith.constant 5.000000e-01 : f32
    %66 = vector.broadcast %cst_22 : f32 to vector<1x1x128xf32>
    %67 = arith.mulf %66, %31 : vector<1x1x128xf32>
    %68 = arith.subf %29, %67 : vector<1x1x128xf32>
    %cst_23 = arith.constant 5.000000e-01 : f32
    %69 = vector.broadcast %cst_23 : f32 to vector<1x1x128xf32>
    %70 = arith.mulf %69, %30 : vector<1x1x128xf32>
    %71 = arith.addf %28, %70 : vector<1x1x128xf32>
    %cst_24 = arith.constant 5.000000e-01 : f32
    %72 = vector.broadcast %cst_24 : f32 to vector<1x1x128xf32>
    %73 = arith.mulf %72, %31 : vector<1x1x128xf32>
    %74 = arith.addf %29, %73 : vector<1x1x128xf32>
    %75 = arith.subf %59, %53 : vector<1x8x1xf32>
    %76 = arith.subf %62, %56 : vector<1x8x1xf32>
    %77 = arith.mulf %75, %76 : vector<1x8x1xf32>
    %78 = arith.subf %71, %65 : vector<1x1x128xf32>
    %79 = arith.subf %74, %68 : vector<1x1x128xf32>
    %80 = arith.mulf %78, %79 : vector<1x1x128xf32>
    %81 = vector.broadcast %59 : vector<1x8x1xf32> to vector<1x8x128xf32>
    %82 = vector.broadcast %71 : vector<1x1x128xf32> to vector<1x8x128xf32>
    %83 = arith.minimumf %81, %82 : vector<1x8x128xf32>
    %84 = vector.broadcast %53 : vector<1x8x1xf32> to vector<1x8x128xf32>
    %85 = vector.broadcast %65 : vector<1x1x128xf32> to vector<1x8x128xf32>
    %86 = arith.maximumf %84, %85 : vector<1x8x128xf32>
    %87 = arith.subf %83, %86 : vector<1x8x128xf32>
    %cst_25 = arith.constant 0.000000e+00 : f32
    %88 = vector.broadcast %cst_25 : f32 to vector<1x8x128xf32>
    %89 = arith.maximumf %87, %88 : vector<1x8x128xf32>
    %90 = vector.broadcast %62 : vector<1x8x1xf32> to vector<1x8x128xf32>
    %91 = vector.broadcast %74 : vector<1x1x128xf32> to vector<1x8x128xf32>
    %92 = arith.minimumf %90, %91 : vector<1x8x128xf32>
    %93 = vector.broadcast %56 : vector<1x8x1xf32> to vector<1x8x128xf32>
    %94 = vector.broadcast %68 : vector<1x1x128xf32> to vector<1x8x128xf32>
    %95 = arith.maximumf %93, %94 : vector<1x8x128xf32>
    %96 = arith.subf %92, %95 : vector<1x8x128xf32>
    %cst_26 = arith.constant 0.000000e+00 : f32
    %97 = vector.broadcast %cst_26 : f32 to vector<1x8x128xf32>
    %98 = arith.maximumf %96, %97 : vector<1x8x128xf32>
    %99 = arith.mulf %89, %98 : vector<1x8x128xf32>
    %100 = vector.broadcast %77 : vector<1x8x1xf32> to vector<1x8x128xf32>
    %101 = vector.broadcast %80 : vector<1x1x128xf32> to vector<1x8x128xf32>
    %102 = arith.addf %100, %101 : vector<1x8x128xf32>
    %103 = arith.subf %102, %99 : vector<1x8x128xf32>
    %cst_27 = arith.constant 1.000000e-07 : f32
    %104 = vector.broadcast %cst_27 : f32 to vector<1x8x128xf32>
    %105 = arith.maximumf %103, %104 : vector<1x8x128xf32>
    %106 = tpu.reciprocal %105 {approx = true} : vector<1x8x128xf32> -> vector<1x8x128xf32>
    %107 = arith.mulf %99, %106 : vector<1x8x128xf32>
    %108 = vector.broadcast %59 : vector<1x8x1xf32> to vector<1x8x128xf32>
    %109 = vector.broadcast %71 : vector<1x1x128xf32> to vector<1x8x128xf32>
    %110 = arith.maximumf %108, %109 : vector<1x8x128xf32>
    %111 = vector.broadcast %53 : vector<1x8x1xf32> to vector<1x8x128xf32>
    %112 = vector.broadcast %65 : vector<1x1x128xf32> to vector<1x8x128xf32>
    %113 = arith.minimumf %111, %112 : vector<1x8x128xf32>
    %114 = arith.subf %110, %113 : vector<1x8x128xf32>
    %cst_28 = arith.constant 0.000000e+00 : f32
    %115 = vector.broadcast %cst_28 : f32 to vector<1x8x128xf32>
    %116 = arith.maximumf %114, %115 : vector<1x8x128xf32>
    %117 = vector.broadcast %62 : vector<1x8x1xf32> to vector<1x8x128xf32>
    %118 = vector.broadcast %74 : vector<1x1x128xf32> to vector<1x8x128xf32>
    %119 = arith.maximumf %117, %118 : vector<1x8x128xf32>
    %120 = vector.broadcast %56 : vector<1x8x1xf32> to vector<1x8x128xf32>
    %121 = vector.broadcast %68 : vector<1x1x128xf32> to vector<1x8x128xf32>
    %122 = arith.minimumf %120, %121 : vector<1x8x128xf32>
    %123 = arith.subf %119, %122 : vector<1x8x128xf32>
    %cst_29 = arith.constant 0.000000e+00 : f32
    %124 = vector.broadcast %cst_29 : f32 to vector<1x8x128xf32>
    %125 = arith.maximumf %123, %124 : vector<1x8x128xf32>
    %126 = arith.mulf %116, %125 : vector<1x8x128xf32>
    %cst_30 = arith.constant 1.000000e-07 : f32
    %127 = vector.broadcast %cst_30 : f32 to vector<1x8x128xf32>
    %128 = arith.maximumf %126, %127 : vector<1x8x128xf32>
    %129 = tpu.reciprocal %128 {approx = true} : vector<1x8x128xf32> -> vector<1x8x128xf32>
    %130 = arith.subf %126, %103 : vector<1x8x128xf32>
    %131 = arith.mulf %130, %129 : vector<1x8x128xf32>
    %132 = arith.subf %107, %131 : vector<1x8x128xf32>
    %cst_31 = arith.constant 5.000000e+00 : f32
    %133 = vector.broadcast %cst_31 : f32 to vector<1x8x128xf32>
    %134 = arith.mulf %133, %50 : vector<1x8x128xf32>
    %cst_32 = arith.constant 2.000000e+00 : f32
    %135 = vector.broadcast %cst_32 : f32 to vector<1x8x128xf32>
    %136 = arith.mulf %135, %21 : vector<1x8x128xf32>
    %137 = arith.addf %134, %136 : vector<1x8x128xf32>
    %cst_33 = arith.constant 0.000000e+00 : f32
    %138 = vector.broadcast %cst_33 : f32 to vector<1x8x128xf32>
    %139 = arith.subf %138, %132 : vector<1x8x128xf32>
    %cst_34 = arith.constant 2.000000e+00 : f32
    %140 = vector.broadcast %cst_34 : f32 to vector<1x8x128xf32>
    %141 = arith.mulf %140, %139 : vector<1x8x128xf32>
    %142 = arith.addf %137, %141 : vector<1x8x128xf32>
    %c0_35 = arith.constant 0 : index
    %c0_36 = arith.constant 0 : index
    %c0_37 = arith.constant 0 : index
    %143 = vector.load %arg5[%c0_35, %c0_36, %c0_37] : memref<1x8x128xf32, #tpu.memory_space<vmem>>, vector<1x8x128xf32>
    tpu.vector_store %arg5[%c0_35, %c0_36, %c0_37], %142 {strides = array<i32>} : memref<1x8x128xf32, #tpu.memory_space<vmem>>, vector<1x8x128xf32>,
    return
  }
  func.func @transform_0(%arg0: i32) -> (i32, i32, i32) {
    %c0_i32 = arith.constant 0 : i32
    %c0_i32_0 = arith.constant 0 : i32
    %c0_i32_1 = arith.constant 0 : i32
    return %arg0, %c0_i32, %c0_i32_0 : i32, i32, i32
  }
  func.func @transform_1(%arg0: i32) -> (i32, i32, i32) {
    %c0_i32 = arith.constant 0 : i32
    %c0_i32_0 = arith.constant 0 : i32
    %c0_i32_1 = arith.constant 0 : i32
    return %arg0, %c0_i32, %c0_i32_0 : i32, i32, i32
  }
  func.func @transform_2(%arg0: i32) -> (i32, i32, i32) {
    %c0_i32 = arith.constant 0 : i32
    %c0_i32_0 = arith.constant 0 : i32
    %c0_i32_1 = arith.constant 0 : i32
    return %arg0, %c0_i32, %c0_i32_0 : i32, i32, i32
  }
  func.func @transform_3(%arg0: i32) -> (i32, i32, i32) {
    %c0_i32 = arith.constant 0 : i32
    %c0_i32_0 = arith.constant 0 : i32
    %c0_i32_1 = arith.constant 0 : i32
    return %arg0, %c0_i32, %c0_i32_0 : i32, i32, i32
  }
  func.func @transform_4(%arg0: i32) -> (i32, i32, i32) {
    %c0_i32 = arith.constant 0 : i32
    %c0_i32_0 = arith.constant 0 : i32
    %c0_i32_1 = arith.constant 0 : i32
    return %arg0, %c0_i32, %c0_i32_0 : i32, i32, i32
  }
  func.func @transform_5(%arg0: i32) -> (i32, i32, i32) {
    %c0_i32 = arith.constant 0 : i32
    %c0_i32_0 = arith.constant 0 : i32
    %c0_i32_1 = arith.constant 0 : i32
    return %arg0, %c0_i32, %c0_i32_0 : i32, i32, i32
  }
}

</mosaic_0001>

<bundles_post_ra>
// kernel: tpu_custom_call.1
= control target key start
LH: loop header
LB: loop body
LE: loop exit
PB: predicated region body
PF: predicated region fallthrough
CT: control target
= control target key end

     0   :  { %11 = vsyncpa [#allocation3], 0  ;;  %s881_s0 = inlined_call_operand.vmem [shape: f32[2,8,4], index: 0, kind: input, shape index: {}]   ;;  %s882_s1 = inlined_call_operand.vmem [shape: f32[2,8,4], index: 1, kind: input, shape index: {}]   ;;  %s883_s2 = inlined_call_operand.vmem [shape: s32[2,1,128], index: 2, kind: input, shape index: {}]   ;;  %s884_s3 = inlined_call_operand.vmem [shape: f32[2,4,128], index: 3, kind: input, shape index: {}]   ;;  %s885_s4 = inlined_call_operand.hbm [shape: f32[2,8,128], index: 4, kind: output, shape index: {0}]   ;;  %s886_s5 = inlined_call_operand.vmem [shape: f32[2,8,4], index: 5, kind: output, shape index: {1}]  }
   0x1   :  { %13 = vsyncpa [#allocation3 + $0x1], 0  ;;  %s770_s18 = smov 0   ;;  %s772_s19 = smov 0  }
   0x2   :  { %s774_s20 = smov 0   ;;  %s776_s21 = smov 0  }
   0x3 LB: > { %s791_s22 = sadd.s32 4294967295, %s731_s21   ;;  %s590_s23 = sadd.s32 4294967294, %s731_s21   ;;  %s731_s21 = sphi %s776_s21, %s892_s21   ;;  %s727_s20 = sphi %s774_s20, %s891_s20   ;;  %s723_s19 = sphi %s772_s19, %s890_s19   ;;  %s719_s18 = sphi %s770_s18, %s889_s18  }
   0x4   : > { %s795_s24 = sadd.s32 1, %s731_s21   ;;  %s130_s25 = sadd.s32 1, %s727_s20 }
   0x5   : > { %s127_s26 = ssub.s32 %s731_s21, %s795_s24  ;;  %p140_p0 = scmp.ne.s32.totalorder %s727_s20, %s723_s19 }
   0x6   : > { %p128_p1 = scmp.eq.s32.totalorder %s127_s26, 0  ;;  %p141_p2 = scmp.eq.s32.totalorder %s791_s22, 1 }
   0x7   : > { %p146_p3 = scmp.ne.s32.totalorder %s723_s19, %s719_s18  ;;  %p147_p4 = scmp.eq.s32.totalorder %s590_s23, 1 }
   0x8   : > { %s806_s27 = scalar_select %p128_p1, %s727_s20, %s130_s25  }
   0x9   : > { %p808_p5 = por %p141_p2, %p140_p0  ;;  %p812_p6 = por %p147_p4, %p146_p3 }
   0xa   : > { %p593_p7 = scmp.ge.s32.totalorder %s731_s21, 1  ;;  %p218_p8 = scmp.lt.s32.totalorder %s731_s21, 3 }
   0xc   : > { %p219_p9 = pnand %p593_p7, %p218_p8 }
   0xd   : > { %p260_p10 = scmp.lt.s32.totalorder (!%p219_p9), %s791_s22, 1  ;;  %s733_s13 = smov (!%p219_p9), 126  }
   0xe   : > { %222 = sbr.rel (%p219_p9) target bundleno = 419 (0x1a3), region = 36  ;;  %s736_s14 = smov (!%p219_p9), 127  }
   0xf   : > { %s603_s11 = sshll.u32 (!%p219_p9), %s791_s22, 3  ;;  %s689_s8 = scalar_lea.hbm (!%p219_p9), %s885_s4, 16 }
  0x13   : > { %s820_s30 = scalar_select %p260_p10, %s791_s22, 1  ;;  %vm280_vm0 = vcmask 31744   ;;  %v734_v4 = vmov 0   ;;  %v735_v5 = vmov 1   ;;  %v296_v15 = vlaneseq }
  0x14   : > { %652 = vset.pattern.permute.xlu2 %v734_v4  ;;  %654 = vset.pattern.permute.xlu1 %v735_v5  ;;  %v737_v18 = vmov 2   ;;  %vm305_vm2 = vcmask 1043456   ;;  %v738_v19 = vmov 0.0   ;;  %v739_v27 = vmov 3  }
  0x15   : > { %s823_s6 = sshll.u32 %s820_s30, 3  ;;  %653 = vset.pattern.permute.xlu0 %v735_v5  ;;  %s270_s17 = scalar_lea.vmem %s883_s2, %s820_s30  ;;  %v297_v16 = vshrl.u32 %v296_v15, 7 }
  0x16   : > { %s263_s9 = scalar_lea.vmem %s881_s0, %s823_s6  ;;  %s267_s12 = scalar_lea.vmem %s882_s1, %s823_s6  ;;  %v660_v17 = vld [vmem:[%s270_s17] ss:$0 sm:$0xff] }
  0x17   : > { %v279_v0 = vld [vmem:[%s263_s9] sm:$0xff]  ;;  %vm299_vm1 = vcmp.eq.s32.totalorder %v660_v17, %v297_v16  ;;  %s278_s26 = scalar_lea.vmem %s886_s5, %s823_s6  ;;  %s597_s7 = sshll.u32 %s820_s30, 2 }
  0x18   : > { %v330_v1 = vld [vmem:[%s267_s12] sm:$0xff]  ;;  %v281_v2 = vsel %vm280_vm0, %v279_v0, -inf  ;;  %v599_v20 = vsel %vm299_vm1, 1.0, %v738_v19  ;;  %s274_s10 = scalar_lea.vmem %s884_s3, %s597_s7  ;;  %s251_s30 = sand.u32 1, %s723_s19  }
  0x19   : > { %v364_v3 = vmul.f32 0.5, %v330_v1  ;;  %282 = vmax.xlane.f32.xlu0 %v281_v2  ;;  %600 = vmatpush.msk.msra.mxu0 %vm305_vm2, %v599_v20  ;;  %v331_v29 = vld [vmem:[%s274_s10] sm:$0xf]  ;;  %s594_s6 = sshll.u32 %s251_s30, 3  ;;  %s452_s22 = scalar_lea.sflag [#allocation3], %s251_s30 }
  0x1a   : > { %v371_v30 = vmul.f32 0.5, %v331_v29  ;;  %v360_v16 = vperm.slane %v331_v29, 3  ;;  %s253_s15 = scalar_lea.vmem [#allocation2], %s594_s6 }
  0x1b   : > { %366 = vrot.lane.b32.xlu1 %v364_v3, %s733_s13  ;;  %s468_s16 = sshll.u32 %s253_s15, 4  ;;  %s469_s16 = int_to_ptr.vmem [resolvable:$true] %s468_s16 }
  0x1c   : > { %v373_v31 = vrot.slane %v371_v30, 2 }
  0x1e   : > { %v376_v33 = vadd.f32 %v373_v31, %v331_v29  ;;  %v375_v34 = vsub.f32 %v331_v29, %v373_v31 }
  0x20   : > { %v383_v35 = vsub.f32 %v376_v33, %v375_v34  ;;  %v414_v36 = vperm.slane %v375_v34, 1  ;;  %v408_v37 = vperm.slane %v376_v33, 1  ;;  %v393_v40 = vperm.slane %v376_v33, 0 }
  0x21   : > { %v400_v41 = vperm.slane %v375_v34, 0 }
  0x22   : > { %v385_v42 = vrot.slane %v383_v35, 1 }
  0x24   : > { %v387_v48 = vmul.f32 %v385_v42, %v383_v35 }
  0x26   : > { %v424_v53 = vperm.slane %v387_v48, 0 }
  0x8c   : > { %v283_v7 = vpop.xlane.xlu0 %282 }
  0x8d   : > { %v367_v6 = vpop.permute.xlu1 %366  ;;  %v284_v10 = vsub.f32 %v279_v0, %v283_v7 }
  0x8e   : > { %v369_v8 = vsub.f32 %v330_v1, %v367_v6  ;;  %v370_v9 = vadd.f32 %v367_v6, %v330_v1 }
  0x8f   : > { %v285_v11 = vmul.f32 1.442695, %v284_v10  ;;  %v352_v10 = vperm.slane %v331_v29, 2 }
  0x90   : > { %v377_v12 = vsub.f32 %v370_v9, %v369_v8  ;;  %390 = vperm.xlu2 %652, %v370_v9  }
  0x91   : > { %661 = vpow2.f32 %v285_v11 }
  0x92   : > { %379 = vrot.lane.b32.xlu1 %v377_v12, %s736_s14  ;;  %s466_s14 = scalar_lea.hbm %s885_s4, %s603_s11 }
  0x93   : > { %s470_s17 = sshll.u32 %s466_s14, 4  ;;  %s471_s17 = int_to_ptr.hbm [resolvable:$true] %s470_s17 }
  0x94   : > { %s683_s23 = sshra.s32 %s471_s17, 4  ;;  %s684_s23 = int_to_ptr.hbm [resolvable:$true] %s683_s23 }
  0x95   : > { %s685_s25 = scalar_lea.hbm %s684_s23, 8  ;;  %p690_p0 = scmp.lt.s32.totalorder %s684_s23, %s885_s4 }
  0x96   : > { %p686_p11 = scmp.ne.s32.totalorder %s684_s23, %s685_s25  ;;  %p691_p1 = scmp.lt.s32.totalorder %s689_s8, %s685_s25 }
  0x97   : > { %v662_v13 = vpop.eup %661 }
  0x98   : > { %397 = vperm.xlu2 %652, %v369_v8   ;;  %v287_v14 = vsel %vm280_vm0, %v662_v13, 0.0  ;;  %p687_p12 = pnand %p686_p11, %p808_p5  ;;  %p692_p2 = por %p691_p1, %p690_p0 }
  0x99   : > { %288 = vadd.xlane.f32.xlu0 %v287_v14 }
  0x9a   : > { %411 = vperm.xlu1 %654, %v369_v8   ;;  %p688_p13 = pneg %p687_p12 }
  0x9c   : > { %p693_p3 = pnand %p692_p2, %p688_p13 }
  0xa2   : > { %655 = vset.pattern.permute.xlu1 %v734_v4 }
  0xa3   : > { %334 = vperm.xlu1 %655, %v330_v1  }
  0xab   : > { %657 = vset.pattern.permute.xlu1 %v737_v18 }
  0xac   : > { %349 = vperm.xlu1 %657, %v330_v1  }
  0xad   : > { %405 = vperm.xlu0 %653, %v370_v9  }
  0xb5   : > { %659 = vset.pattern.permute.xlu0 %v734_v4  ;;  %v337_v4 = vperm.slane %v331_v29, 0 }
  0xea   : > { %v391_v32 = vpop.permute.xlu2 %390 }
  0xeb   : > { %v394_v46 = vmin.f32 %v391_v32, %v393_v40  ;;  %v430_v55 = vmax.f32 %v391_v32, %v393_v40 }
  0xf2   : > { %v398_v43 = vpop.permute.xlu2 %397 }
  0xf3   : > { %v401_v47 = vmax.f32 %v398_v43, %v400_v41  ;;  %v431_v56 = vmin.f32 %v398_v43, %v400_v41 }
  0xf5   : > { %v402_v50 = vsub.f32 %v394_v46, %v401_v47  ;;  %v432_v61 = vsub.f32 %v430_v55, %v431_v56 }
  0xf7   : > { %v403_v58 = vmax.f32 %v402_v50, 0.0  ;;  %v433_v2 = vmax.f32 %v432_v61, 0.0 }
 0x104   : > { %v380_v21 = vpop.permute.xlu1 %379 }
 0x105   : > { %v382_v22 = vmul.f32 %v380_v21, %v377_v12 }
 0x107   : > { %421 = vperm.xlu2 %652, %v382_v22  }
 0x10c   : > { %v289_v23 = vpop.xlane.xlu0 %288  ;;  %v412_v38 = vpop.permute.xlu1 %411 }
 0x10d   : > { %663 = vlog2.f32 %v289_v23  ;;  %v415_v44 = vmax.f32 %v412_v38, %v414_v36  ;;  %v435_v51 = vmin.f32 %v412_v38, %v414_v36 }
 0x10f   : > { %656 = vset.pattern.permute.xlu2 %v735_v5  ;;  %v344_v5 = vperm.slane %v331_v29, 1 }
 0x110   : > { %341 = vperm.xlu2 %656, %v330_v1  }
 0x113   : > { %v664_v24 = vpop.eup %663 }
 0x114   : > { %v291_v25 = vmul.f32 0.6931472, %v664_v24 }
 0x115   : > { %v335_v63 = vpop.permute.xlu1 %334 }
 0x116   : > { %v292_v26 = vadd.f32 %v291_v25, %v283_v7  ;;  %v338_v8 = vsub.f32 %v335_v63, %v337_v4 }
 0x118   : > { %658 = vset.pattern.permute.xlu2 %v739_v27  ;;  %v293_v28 = vsub.f32 %v279_v0, %v292_v26  ;;  %v339_v13 = vand.u32 2147483647, %v338_v8 }
 0x119   : > { %357 = vperm.xlu2 %658, %v330_v1  }
 0x11a   : > { %294 = vst.msk [vmem:[%s278_s26] sm:$0xff] %vm280_vm0, %v293_v28  ;;  %601 = vmatmul.msk.f32.vlgmr.msra.gmra.mxu0 %vm280_vm0, %v293_v28 }
 0x11e   : > { %v350_v12 = vpop.permute.xlu1 %349 }
 0x11f   : > { %v406_v39 = vpop.permute.xlu0 %405  ;;  %v353_v15 = vsub.f32 %v350_v12, %v352_v10 }
 0x120   : > { %v409_v45 = vmin.f32 %v406_v39, %v408_v37  ;;  %v434_v52 = vmax.f32 %v406_v39, %v408_v37 }
 0x121   : > { %v354_v21 = vand.u32 2147483647, %v353_v15 }
 0x122   : > { %v416_v49 = vsub.f32 %v409_v45, %v415_v44  ;;  %v436_v59 = vsub.f32 %v434_v52, %v435_v51 }
 0x124   : > { %v417_v57 = vmax.f32 %v416_v49, 0.0  ;;  %v437_v0 = vmax.f32 %v436_v59, 0.0 }
 0x126   : > { %v418_v62 = vmul.f32 %v417_v57, %v403_v58  ;;  %v438_v6 = vmul.f32 %v437_v0, %v433_v2 }
 0x128   : > { %v439_v11 = vmax.f32 %v438_v6, 1e-07 }
 0x161   : > { %v422_v54 = vpop.permute.xlu2 %421 }
 0x162   : > { %v425_v60 = vadd.f32 %v424_v53, %v422_v54 }
 0x164   : > { %v426_v1 = vsub.f32 %v425_v60, %v418_v62 }
 0x166   : > { %v427_v7 = vmax.f32 %v426_v1, 1e-07  ;;  %v441_v19 = vsub.f32 %v438_v6, %v426_v1 }
 0x168   : > { %665 = vrcp.f32 %v427_v7 }
 0x169   : > { %667 = vrcp.f32 %v439_v11 }
 0x16a   : > { %v342_v3 = vpop.permute.xlu2 %341 }
 0x16b   : > { %v345_v9 = vsub.f32 %v342_v3, %v344_v5 }
 0x16d   : > { %v346_v14 = vand.u32 2147483647, %v345_v9 }
 0x16e   : > { %v666_v18 = vpop.eup %665 }
 0x16f   : > { %v347_v20 = vadd.f32 %v346_v14, %v339_v13  ;;  %v429_v23 = vmul.f32 %v666_v18, %v418_v62  ;;  %v668_v24 = vpop.eup %667 }
 0x170   : > { %v442_v25 = vmul.f32 %v668_v24, %v441_v19 }
 0x171   : > { %v355_v26 = vadd.f32 %v354_v21, %v347_v20 }
 0x172   : > { %v443_v28 = vsub.f32 %v429_v23, %v442_v25 }
 0x173   : > { %v358_v17 = vpop.permute.xlu2 %357 }
 0x174   : > { %v361_v22 = vsub.f32 %v358_v17, %v360_v16  ;;  %v447_v32 = vsub.f32 0.0, %v443_v28 }
 0x176   : > { %v362_v27 = vand.u32 2147483647, %v361_v22  ;;  %v448_v36 = vmul.f32 2.0, %v447_v32 }
 0x178   : > { %v363_v30 = vadd.f32 %v362_v27, %v355_v26 }
 0x17a   : > { %v444_v33 = vmul.f32 5.0, %v363_v30 }
 0x197   : > { %v326_v31 = vpop.f32.mrf.mxu0 }
 0x198   : > { %v329_v29 = vsub.f32 0.0, %v326_v31 }
 0x19a   : > { %v445_v34 = vmul.f32 2.0, %v329_v29 }
 0x19c   : > { %v446_v35 = vadd.f32 %v445_v34, %v444_v33 }
 0x19e   : > { %v449_v37 = vadd.f32 %v448_v36, %v446_v35 }
 0x1a0   : > { %450 = vst [vmem:[%s253_s15] sm:$0xff] %v449_v37 }
 0x1a1   : > { %696 = shalt.err (!%p693_p3)
}
 0x1a2   : > { %606 = dma.vmem_to_hbm [thread:$0]  (%p808_p5), %s469_s16, 128, %s471_s17, %s452_s22  }
 0x1a3 PF: > { %p612_p4 = scmp.ge.s32.totalorder %s731_s21, 2  ;;  %s485_s30 = sand.u32 1, %s719_s18  }
 0x1a4   : > { %s486_s6 = scalar_lea.sflag [#allocation3], %s485_s30 }
 0x1a5   : > { %p609_p7 = pnand %p612_p4, %p812_p6 }
 0x1a7   : > { %p610_p8 = pneg %p609_p7 }
 0x1a9   : > { %714 = dma.done.wait (%p610_p8), %s486_s6, 128  }
 0x1aa   : > { %716 = vsyncadd (%p610_p8), %s486_s6, 4294967168  ;;  %p16_p9 = scmp.ge.s32.totalorder %s795_s24, 4   ;;  %s889_s18 = smov %s723_s19 }
 0x1ab   : > { %s890_s19 = smov %s727_s20  ;;  %s891_s20 = smov %s806_s27 }
 0x1ac   : > { %s892_s21 = smov %s795_s24  ;;  %18 = sbr.rel (!%p16_p9) target bundleno = 3 (0x3), region = 92 }
 0x1b1   :  { %499 = vsyncpa [#allocation3], 1 }
 0x1b2   :  { %501 = vsyncpa [#allocation3 + $0x1], 1 }

</bundles_post_ra>
